<compile_context>
chip_gen: v7x
topology: tpu7x:2x2x1
jax: 0.10.0
libtpu: 0.0.40
codegen_flags: <defaults>
</compile_context>

<pallas_src>
import functools

import jax
import jax.numpy as jnp
from jax import lax
from jax.experimental import pallas as pl
from jax.experimental.pallas import tpu as pltpu


# ---------------------------------------------------------------------------
# Fused kernel: projections -> normalize -> pairwise sims -> CE loss -> mean
# ---------------------------------------------------------------------------
def _clip_fused_kernel(tau_ref, *refs):
    """refs = (x_0, w_0, b_0, ..., x_{V-1}, w_{V-1}, b_{V-1}, zmean_ref, loss_ref)."""
    V = (len(refs) - 2) // 3
    zmean_ref, loss_ref = refs[-2], refs[-1]
    B = zmean_ref.shape[0]

    # sqrt(1/exp(tau)) folded into each normalized side (==  sims / exp(tau)).
    s_it = jnp.exp(tau_ref[0] * -0.5)

    # --- projections + normalization (everything stays in VMEM/vregs) -------
    zs = []   # raw projections, f32 (B, Dp)
    zn = []   # L2-normalized * sqrt(inv_temp), bf16 for the MXU
    for v in range(V):
        x_ref, w_ref, b_ref = refs[3 * v], refs[3 * v + 1], refs[3 * v + 2]
        z = jnp.dot(x_ref[...].astype(jnp.bfloat16),
                    w_ref[...].astype(jnp.bfloat16),
                    preferred_element_type=jnp.float32) + b_ref[...]
        zs.append(z)
        ssq = jnp.sum(z * z, axis=1, keepdims=True)
        # F.normalize(dim=1, eps=1e-12):  z / max(||z||, 1e-12)
        scale = lax.rsqrt(jnp.maximum(ssq, 1e-24)) * s_it
        zn.append((z * scale).astype(jnp.bfloat16))

    # --- mean (unnormalized) embedding, written first to retire zs early ----
    acc = zs[0]
    for v in range(1, V):
        acc = acc + zs[v]
    zmean_ref[...] = (acc / V).astype(zmean_ref.dtype)

    # --- contrastive loss ----------------------------------------------------
    # sims_i = sum_{j != i} zn_i zn_j^T   (temperature already folded in)
    # loss   = mean_i mean_b( logsumexp_row(sims_i)[b] - sims_i[b, b] )
    # Only the SUM over b of the diagonal is needed, so it is computed straight
    # from the embeddings instead of being masked out of the (B, B) matrix.
    dn = (((1,), (1,)), ((), ()))  # contract feature dims; no explicit .T

    def row_lse_sum(s):            # sum_b logsumexp(s[b, :])
        m = jnp.max(s, axis=1, keepdims=True)
        return jnp.sum(m + jnp.log(jnp.sum(jnp.exp(s - m), axis=1, keepdims=True)))

    def col_lse_sum(s):            # sum_b logsumexp(s[:, b])  == rows of s.T
        m = jnp.max(s, axis=0, keepdims=True)
        return jnp.sum(m + jnp.log(jnp.sum(jnp.exp(s - m), axis=0, keepdims=True)))

    if V == 2:
        # Symmetry: one Gram matrix serves both views (rows / columns).
        g = lax.dot_general(zn[0], zn[1], dn, preferred_element_type=jnp.float32)
        diag_sum = jnp.sum(zn[0].astype(jnp.float32) * zn[1].astype(jnp.float32))
        total = (row_lse_sum(g) + col_lse_sum(g) - 2.0 * diag_sum) / B
    else:
        total = jnp.zeros((), jnp.float32)
        for i in range(V):
            zi32 = zn[i].astype(jnp.float32)
            s = None
            dsum = jnp.zeros((), jnp.float32)
            for j in range(V):
                if j == i:
                    continue
                gij = lax.dot_general(zn[i], zn[j], dn,
                                      preferred_element_type=jnp.float32)
                s = gij if s is None else s + gij
                dsum = dsum + jnp.sum(zi32 * zn[j].astype(jnp.float32))
            total = total + (row_lse_sum(s) - dsum) / B

    loss_ref[...] = jnp.reshape(total / V, (1, 1))


def _round_up(x, m):
    return (x + m - 1) // m * m


# ---------------------------------------------------------------------------
# CLIPEmbedder.forward(X, calc_loss=True)  ==  clip_embedder_forward(...)
# ---------------------------------------------------------------------------
@functools.partial(jax.jit, static_argnames=("names",))
def clip_embedder_forward(names, X, params, tau):
    """Returns (z_mean, loss) exactly like the PyTorch module's forward()."""
    V = len(names)
    assert V >= 2, "CLIP loss needs at least two modalities"
    B = X[names[0]].shape[0]
    D = params[names[0]]["w"].shape[1]
    Dp = _round_up(D, 128)        # lane-dense embedding dim (zero padding)

    args = [tau.astype(jnp.float32).reshape(1)]
    in_specs = [pl.BlockSpec(memory_space=pltpu.MemorySpace.SMEM)]  # scalar tau
    for v in names:
        x = X[v].astype(jnp.float32)
        w = jnp.pad(params[v]["w"].astype(jnp.float32), ((0, 0), (0, Dp - D)))
        b = jnp.pad(params[v]["b"].astype(jnp.float32), (0, Dp - D)).reshape(1, Dp)
        din = x.shape[1]
        args += [x, w, b]
        in_specs += [
            pl.BlockSpec((B, din), lambda i: (0, 0)),
            pl.BlockSpec((din, Dp), lambda i: (0, 0)),
            pl.BlockSpec((1, Dp), lambda i: (0, 0)),
        ]

    z_pad, loss = pl.pallas_call(
        _clip_fused_kernel,
        out_shape=(jax.ShapeDtypeStruct((B, Dp), jnp.float32),
                   jax.ShapeDtypeStruct((1, 1), jnp.float32)),
        grid=(1,),
        in_specs=in_specs,
        out_specs=(pl.BlockSpec((B, Dp), lambda i: (0, 0)),
                   pl.BlockSpec((1, 1), lambda i: (0, 0))),
        compiler_params=pltpu.CompilerParams(
            dimension_semantics=("arbitrary",),
            vmem_limit_bytes=32 * 1024 * 1024,
        ),
    )(*args)
    return z_pad[:, :D], loss[0, 0]


# ---------------------------------------------------------------------------
# Pure-JAX references (correctness checks only)
# ---------------------------------------------------------------------------
def reference_forward_f32(names, X, params, tau):
    """Faithful f32 port of the PyTorch module."""
    zs = [X[v] @ params[v]["w"] + params[v]["b"] for v in names]
    V = len(zs)
    zn = [z / jnp.maximum(jnp.linalg.norm(z, axis=1, keepdims=True), 1e-12)
          for z in zs]
    inv_temp = jnp.exp(-tau)
    loss = 0.0
    for i in range(V):
        sims = sum(zn[i] @ zn[j].T for j in range(V) if j != i) * inv_temp
        lse = jax.nn.logsumexp(sims, axis=1)
        loss = loss + jnp.mean(lse - jnp.diagonal(sims))
    return sum(zs) / V, loss / V


def reference_forward_bf16(names, X, params, tau):
    """Mirrors the kernel's internal math (bf16 MXU operands, f32 accumulation,
    temperature folded into the normalized embeddings) for a tight check."""
    s_it = jnp.exp(tau * -0.5)
    zs, zn = [], []
    for v in names:
        z = jnp.dot(X[v].astype(jnp.bfloat16),
                    params[v]["w"].astype(jnp.bfloat16),
                    preferred_element_type=jnp.float32) + params[v]["b"]
        zs.append(z)
        ssq = jnp.sum(z * z, axis=1, keepdims=True)
        zn.append((z * (lax.rsqrt(jnp.maximum(ssq, 1e-24)) * s_it))
                  .astype(jnp.bfloat16))
    V = len(zs)
    loss = 0.0
    for i in range(V):
        sims = sum(jnp.dot(zn[i], zn[j].T, preferred_element_type=jnp.float32)
                   for j in range(V) if j != i)
        lse = jax.nn.logsumexp(sims, axis=1)
        loss = loss + jnp.mean(lse - jnp.diagonal(sims))
    return sum(zs) / V, loss / V


if __name__ == "__main__":
    key = jax.random.PRNGKey(0)

    # Small synthetic config: 2 modalities, batch 8, embed dim 32.
    B, D = 8, 32
    in_dims = {"image": 16, "text": 24}
    names = tuple(in_dims.keys())
    tau = jnp.log(jnp.asarray(0.07, jnp.float32))

    params, X = {}, {}
    for v, din in in_dims.items():
        key, kw, kb, kx = jax.random.split(key, 4)
        params[v] = {
            "w": jax.random.normal(kw, (din, D), jnp.float32) / jnp.sqrt(din),
            "b": jax.random.normal(kb, (D,), jnp.float32) * 0.01,
        }
        X[v] = jax.random.normal(kx, (B, din), jnp.float32)

    z, loss = clip_embedder_forward(names, X, params, tau)
    jax.block_until_ready((z, loss))

    # Tight check vs a reference that mirrors the in-kernel bf16 math.
    z16, l16 = reference_forward_bf16(names, X, params, tau)
    assert jnp.allclose(z, z16, atol=1e-2, rtol=1e-2), "embedding mismatch (bf16 ref)"
    assert jnp.allclose(loss, l16, atol=1e-2, rtol=1e-2), "loss mismatch (bf16 ref)"

    # Looser semantic check vs the full-f32 (PyTorch-faithful) reference.
    z32, l32 = reference_forward_f32(names, X, params, tau)
    assert jnp.allclose(z, z32, atol=5e-2, rtol=5e-2), "embedding mismatch (f32 ref)"
    assert jnp.allclose(loss, l32, atol=5e-2, rtol=5e-2), "loss mismatch (f32 ref)"

    print("KERNEL_OK")
</pallas_src>

<mosaic_0001>
module attributes {stable_mosaic.version = 11 : i64} {
  func.func @_clip_fused_kernel(%arg0: i32, %arg1: memref<1xf32, #tpu.memory_space<smem>>, %arg2: memref<8x16xf32, #tpu.memory_space<vmem>>, %arg3: memref<16x128xf32, #tpu.memory_space<vmem>>, %arg4: memref<1x128xf32, #tpu.memory_space<vmem>>, %arg5: memref<8x24xf32, #tpu.memory_space<vmem>>, %arg6: memref<24x128xf32, #tpu.memory_space<vmem>>, %arg7: memref<1x128xf32, #tpu.memory_space<vmem>>, %arg8: memref<8x128xf32, #tpu.memory_space<vmem>>, %arg9: memref<1x1xf32, #tpu.memory_space<vmem>>) attributes {dimension_semantics = [#tpu.dimension_semantics<arbitrary>], iteration_bounds = array<i64: 1>, scalar_prefetch = 0 : i64, scratch_operands = 0 : i64, tpu.core_type = #tpu.core_type<tc>, window_params = [{transform_indices = @transform_0, window_bounds = array<i64: 1>}, {pipeline_mode = #tpu.pipeline_mode<synchronous>, transform_indices = @transform_1, window_bounds = array<i64: 8, 16>}, {pipeline_mode = #tpu.pipeline_mode<synchronous>, transform_indices = @transform_2, window_bounds = array<i64: 16, 128>}, {pipeline_mode = #tpu.pipeline_mode<synchronous>, transform_indices = @transform_3, window_bounds = array<i64: 1, 128>}, {pipeline_mode = #tpu.pipeline_mode<synchronous>, transform_indices = @transform_4, window_bounds = array<i64: 8, 24>}, {pipeline_mode = #tpu.pipeline_mode<synchronous>, transform_indices = @transform_5, window_bounds = array<i64: 24, 128>}, {pipeline_mode = #tpu.pipeline_mode<synchronous>, transform_indices = @transform_6, window_bounds = array<i64: 1, 128>}, {pipeline_mode = #tpu.pipeline_mode<synchronous>, transform_indices = @transform_7, window_bounds = array<i64: 8, 128>}, {pipeline_mode = #tpu.pipeline_mode<synchronous>, transform_indices = @transform_8, window_bounds = array<i64: 1, 1>}]} {
    %c0 = arith.constant 0 : index
    %0 = memref.load %arg1[%c0] : memref<1xf32, #tpu.memory_space<smem>>
    %cst = arith.constant -5.000000e-01 : f32
    %1 = arith.mulf %0, %cst : f32
    %2 = math.exp %1 : f32
    %c0_0 = arith.constant 0 : index
    %c0_1 = arith.constant 0 : index
    %3 = vector.load %arg2[%c0_0, %c0_1] : memref<8x16xf32, #tpu.memory_space<vmem>>, vector<8x16xf32>
    %4 = arith.truncf %3 : vector<8x16xf32> to vector<8x16xbf16>
    %c0_2 = arith.constant 0 : index
    %c0_3 = arith.constant 0 : index
    %5 = vector.load %arg3[%c0_2, %c0_3] : memref<16x128xf32, #tpu.memory_space<vmem>>, vector<16x128xf32>
    %6 = arith.truncf %5 : vector<16x128xf32> to vector<16x128xbf16>
    %cst_4 = arith.constant dense<0.000000e+00> : vector<8x128xf32>
    %7 = tpu.matmul %4, %6, %cst_4 {dimension_numbers = #tpu.dot_dimension_numbers<[1], [0], [0], [1], [0, 0, 1, 1], [], []>} : vector<8x16xbf16>, vector<16x128xbf16>, vector<8x128xf32> -> vector<8x128xf32>
    %c0_5 = arith.constant 0 : index
    %c0_6 = arith.constant 0 : index
    %8 = vector.load %arg4[%c0_5, %c0_6] : memref<1x128xf32, #tpu.memory_space<vmem>>, vector<1x128xf32>
    %9 = vector.broadcast %8 : vector<1x128xf32> to vector<8x128xf32>
    %10 = arith.addf %7, %9 : vector<8x128xf32>
    %11 = arith.mulf %10, %10 : vector<8x128xf32>
    %cst_7 = arith.constant dense<0.000000e+00> : vector<8xf32>
    %12 = vector.multi_reduction <add>, %11, %cst_7 [1] : vector<8x128xf32> to vector<8xf32>
    %13 = vector.shape_cast %12 : vector<8xf32> to vector<8x1xf32>
    %cst_8 = arith.constant 1.000000e-24 : f32
    %14 = vector.broadcast %cst_8 : f32 to vector<8x1xf32>
    %15 = arith.maximumf %13, %14 : vector<8x1xf32>
    %16 = math.rsqrt %15 : vector<8x1xf32>
    %17 = vector.broadcast %2 : f32 to vector<8x1xf32>
    %18 = arith.mulf %16, %17 : vector<8x1xf32>
    %19 = vector.broadcast %18 : vector<8x1xf32> to vector<8x128xf32>
    %20 = arith.mulf %10, %19 : vector<8x128xf32>
    %21 = arith.truncf %20 : vector<8x128xf32> to vector<8x128xbf16>
    %c0_9 = arith.constant 0 : index
    %c0_10 = arith.constant 0 : index
    %22 = vector.load %arg5[%c0_9, %c0_10] : memref<8x24xf32, #tpu.memory_space<vmem>>, vector<8x24xf32>
    %23 = arith.truncf %22 : vector<8x24xf32> to vector<8x24xbf16>
    %c0_11 = arith.constant 0 : index
    %c0_12 = arith.constant 0 : index
    %24 = vector.load %arg6[%c0_11, %c0_12] : memref<24x128xf32, #tpu.memory_space<vmem>>, vector<24x128xf32>
    %25 = arith.truncf %24 : vector<24x128xf32> to vector<24x128xbf16>
    %cst_13 = arith.constant dense<0.000000e+00> : vector<8x128xf32>
    %26 = tpu.matmul %23, %25, %cst_13 {dimension_numbers = #tpu.dot_dimension_numbers<[1], [0], [0], [1], [0, 0, 1, 1], [], []>} : vector<8x24xbf16>, vector<24x128xbf16>, vector<8x128xf32> -> vector<8x128xf32>
    %c0_14 = arith.constant 0 : index
    %c0_15 = arith.constant 0 : index
    %27 = vector.load %arg7[%c0_14, %c0_15] : memref<1x128xf32, #tpu.memory_space<vmem>>, vector<1x128xf32>
    %28 = vector.broadcast %27 : vector<1x128xf32> to vector<8x128xf32>
    %29 = arith.addf %26, %28 : vector<8x128xf32>
    %30 = arith.mulf %29, %29 : vector<8x128xf32>
    %cst_16 = arith.constant dense<0.000000e+00> : vector<8xf32>
    %31 = vector.multi_reduction <add>, %30, %cst_16 [1] : vector<8x128xf32> to vector<8xf32>
    %32 = vector.shape_cast %31 : vector<8xf32> to vector<8x1xf32>
    %cst_17 = arith.constant 1.000000e-24 : f32
    %33 = vector.broadcast %cst_17 : f32 to vector<8x1xf32>
    %34 = arith.maximumf %32, %33 : vector<8x1xf32>
    %35 = math.rsqrt %34 : vector<8x1xf32>
    %36 = vector.broadcast %2 : f32 to vector<8x1xf32>
    %37 = arith.mulf %35, %36 : vector<8x1xf32>
    %38 = vector.broadcast %37 : vector<8x1xf32> to vector<8x128xf32>
    %39 = arith.mulf %29, %38 : vector<8x128xf32>
    %40 = arith.truncf %39 : vector<8x128xf32> to vector<8x128xbf16>
    %41 = arith.addf %10, %29 : vector<8x128xf32>
    %cst_18 = arith.constant 2.000000e+00 : f32
    %42 = vector.broadcast %cst_18 : f32 to vector<8x128xf32>
    %43 = arith.divf %41, %42 : vector<8x128xf32>
    %c0_19 = arith.constant 0 : index
    %c0_20 = arith.constant 0 : index
    %44 = vector.load %arg8[%c0_19, %c0_20] : memref<8x128xf32, #tpu.memory_space<vmem>>, vector<8x128xf32>
    tpu.vector_store %arg8[%c0_19, %c0_20], %43 {strides = array<i32>} : memref<8x128xf32, #tpu.memory_space<vmem>>, vector<8x128xf32>,
    %cst_21 = arith.constant dense<0.000000e+00> : vector<8x8xf32>
    %45 = tpu.matmul %21, %40, %cst_21 {dimension_numbers = #tpu.dot_dimension_numbers<[1], [1], [0], [0], [0, 0, 1, 0], [], []>} : vector<8x128xbf16>, vector<8x128xbf16>, vector<8x8xf32> -> vector<8x8xf32>
    %46 = arith.extf %21 : vector<8x128xbf16> to vector<8x128xf32>
    %47 = arith.extf %40 : vector<8x128xbf16> to vector<8x128xf32>
    %48 = arith.mulf %46, %47 : vector<8x128xf32>
    %49 = vector.shape_cast %48 : vector<8x128xf32> to vector<1x8x128xf32>
    %cst_22 = arith.constant dense<0.000000e+00> : vector<1xf32>
    %50 = vector.multi_reduction <add>, %49, %cst_22 [1, 2] : vector<1x8x128xf32> to vector<1xf32>
    %51 = vector.shape_cast %50 : vector<1xf32> to vector<1x1x1xf32>
    %52 = vector.extract %51[0, 0, 0] : f32 from vector<1x1x1xf32>
    %cst_23 = arith.constant dense<0xFF800000> : vector<8xf32>
    %53 = vector.multi_reduction <maximumf>, %45, %cst_23 [1] : vector<8x8xf32> to vector<8xf32>
    %54 = vector.shape_cast %53 : vector<8xf32> to vector<8x1xf32>
    %55 = vector.broadcast %54 : vector<8x1xf32> to vector<8x8xf32>
    %56 = arith.subf %45, %55 : vector<8x8xf32>
    %57 = math.exp %56 : vector<8x8xf32>
    %cst_24 = arith.constant dense<0.000000e+00> : vector<8xf32>
    %58 = vector.multi_reduction <add>, %57, %cst_24 [1] : vector<8x8xf32> to vector<8xf32>
    %59 = vector.shape_cast %58 : vector<8xf32> to vector<8x1xf32>
    %60 = math.log %59 : vector<8x1xf32>
    %61 = arith.addf %54, %60 : vector<8x1xf32>
    %62 = vector.shape_cast %61 : vector<8x1xf32> to vector<1x8x1xf32>
    %cst_25 = arith.constant dense<0.000000e+00> : vector<1xf32>
    %63 = vector.multi_reduction <add>, %62, %cst_25 [1, 2] : vector<1x8x1xf32> to vector<1xf32>
    %64 = vector.shape_cast %63 : vector<1xf32> to vector<1x1x1xf32>
    %65 = vector.extract %64[0, 0, 0] : f32 from vector<1x1x1xf32>
    %cst_26 = arith.constant dense<0xFF800000> : vector<8xf32>
    %66 = vector.multi_reduction <maximumf>, %45, %cst_26 [0] : vector<8x8xf32> to vector<8xf32>
    %67 = vector.shape_cast %66 : vector<8xf32> to vector<1x8xf32>
    %68 = vector.broadcast %67 : vector<1x8xf32> to vector<8x8xf32>
    %69 = arith.subf %45, %68 : vector<8x8xf32>
    %70 = math.exp %69 : vector<8x8xf32>
    %cst_27 = arith.constant dense<0.000000e+00> : vector<8xf32>
    %71 = vector.multi_reduction <add>, %70, %cst_27 [0] : vector<8x8xf32> to vector<8xf32>
    %72 = vector.shape_cast %71 : vector<8xf32> to vector<1x8xf32>
    %73 = math.log %72 : vector<1x8xf32>
    %74 = arith.addf %67, %73 : vector<1x8xf32>
    %75 = vector.shape_cast %74 : vector<1x8xf32> to vector<1x1x8xf32>
    %cst_28 = arith.constant dense<0.000000e+00> : vector<1xf32>
    %76 = vector.multi_reduction <add>, %75, %cst_28 [1, 2] : vector<1x1x8xf32> to vector<1xf32>
    %77 = vector.shape_cast %76 : vector<1xf32> to vector<1x1x1xf32>
    %78 = vector.extract %77[0, 0, 0] : f32 from vector<1x1x1xf32>
    %79 = arith.addf %65, %78 : f32
    %cst_29 = arith.constant 2.000000e+00 : f32
    %80 = arith.mulf %cst_29, %52 : f32
    %81 = arith.subf %79, %80 : f32
    %cst_30 = arith.constant 8.000000e+00 : f32
    %82 = arith.divf %81, %cst_30 : f32
    %cst_31 = arith.constant 2.000000e+00 : f32
    %83 = arith.divf %82, %cst_31 : f32
    %84 = vector.broadcast %83 : f32 to vector<1x1xf32>
    %c0_32 = arith.constant 0 : index
    %c0_33 = arith.constant 0 : index
    %85 = vector.load %arg9[%c0_32, %c0_33] : memref<1x1xf32, #tpu.memory_space<vmem>>, vector<1x1xf32>
    tpu.vector_store %arg9[%c0_32, %c0_33], %84 {strides = array<i32>} : memref<1x1xf32, #tpu.memory_space<vmem>>, vector<1x1xf32>,
    return
  }
  func.func @transform_0(%arg0: i32) -> i32 {
    %c0_i32 = arith.constant 0 : i32
    %c0_i32_0 = arith.constant 0 : i32
    return %c0_i32 : i32
  }
  func.func @transform_1(%arg0: i32) -> (i32, i32) {
    %c0_i32 = arith.constant 0 : i32
    %c0_i32_0 = arith.constant 0 : i32
    %c0_i32_1 = arith.constant 0 : i32
    return %c0_i32, %c0_i32_0 : i32, i32
  }
  func.func @transform_2(%arg0: i32) -> (i32, i32) {
    %c0_i32 = arith.constant 0 : i32
    %c0_i32_0 = arith.constant 0 : i32
    %c0_i32_1 = arith.constant 0 : i32
    return %c0_i32, %c0_i32_0 : i32, i32
  }
  func.func @transform_3(%arg0: i32) -> (i32, i32) {
    %c0_i32 = arith.constant 0 : i32
    %c0_i32_0 = arith.constant 0 : i32
    %c0_i32_1 = arith.constant 0 : i32
    return %c0_i32, %c0_i32_0 : i32, i32
  }
  func.func @transform_4(%arg0: i32) -> (i32, i32) {
    %c0_i32 = arith.constant 0 : i32
    %c0_i32_0 = arith.constant 0 : i32
    %c0_i32_1 = arith.constant 0 : i32
    return %c0_i32, %c0_i32_0 : i32, i32
  }
  func.func @transform_5(%arg0: i32) -> (i32, i32) {
    %c0_i32 = arith.constant 0 : i32
    %c0_i32_0 = arith.constant 0 : i32
    %c0_i32_1 = arith.constant 0 : i32
    return %c0_i32, %c0_i32_0 : i32, i32
  }
  func.func @transform_6(%arg0: i32) -> (i32, i32) {
    %c0_i32 = arith.constant 0 : i32
    %c0_i32_0 = arith.constant 0 : i32
    %c0_i32_1 = arith.constant 0 : i32
    return %c0_i32, %c0_i32_0 : i32, i32
  }
  func.func @transform_7(%arg0: i32) -> (i32, i32) {
    %c0_i32 = arith.constant 0 : i32
    %c0_i32_0 = arith.constant 0 : i32
    %c0_i32_1 = arith.constant 0 : i32
    return %c0_i32, %c0_i32_0 : i32, i32
  }
  func.func @transform_8(%arg0: i32) -> (i32, i32) {
    %c0_i32 = arith.constant 0 : i32
    %c0_i32_0 = arith.constant 0 : i32
    %c0_i32_1 = arith.constant 0 : i32
    return %c0_i32, %c0_i32_0 : i32, i32
  }
}

</mosaic_0001>

<bundles_post_ra>
// kernel: clip_embedder_forward.1
= control target key start
LH: loop header
LB: loop body
LE: loop exit
PB: predicated region body
PF: predicated region fallthrough
CT: control target
= control target key end

     0   :  { %15 = vsyncpa [#allocation4], 0  ;;  %v428_v3 = vmov 0.0   ;;  %vm121_vm0 = vcmask 1043456   ;;  %vm429_vm1 = vmmov 0   ;;  %s537_s0 = inlined_call_operand.<no memory space> [shape: f32[1], index: 0, kind: input, shape index: {}]   ;;  %s538_s1 = inlined_call_operand.vmem [shape: f32[8,16], index: 1, kind: input, shape index: {}]   ;;  %s539_s2 = inlined_call_operand.vmem [shape: f32[16,128], index: 2, kind: input, shape index: {}]   ;;  %s540_s3 = inlined_call_operand.vmem [shape: f32[1,128], index: 3, kind: input, shape index: {}]   ;;  %s541_s4 = inlined_call_operand.vmem [shape: f32[8,24], index: 4, kind: input, shape index: {}]   ;;  %s542_s5 = inlined_call_operand.vmem [shape: f32[24,128], index: 5, kind: input, shape index: {}]   ;;  %s543_s6 = inlined_call_operand.vmem [shape: f32[1,128], index: 6, kind: input, shape index: {}]   ;;  %s544_s7 = inlined_call_operand.hbm [shape: f32[8,128], index: 7, kind: output, shape index: {0}]   ;;  %s545_s8 = inlined_call_operand.hbm [shape: f32[1,1], index: 8, kind: output, shape index: {1}]  }
   0x1   :  { %v105_v0 = vld [vmem:[%s542_s5] sm:$0xff]  ;;  %v106_v1 = vld [vmem:[%s542_s5 + $0x8] sm:$0xff]  ;;  %340 = vmatprep.subr.bf16.mxu1 %v428_v3  ;;  %334 = vmatprep.subr.bf16.mxu0 %v428_v3  ;;  %v107_v6 = vld [vmem:[%s542_s5 + $0x10] sm:$0xff] }
   0x2   :  { %v40_v2 = vld [vmem:[%s539_s2] sm:$0xff]  ;;  %v108_v4 = vpack.c.bf16 %v106_v1, %v105_v0  ;;  %v41_v5 = vld [vmem:[%s539_s2 + $0x8] sm:$0xff]  ;;  %v109_v9 = vpack.c.bf16 %v107_v6, %v107_v6  ;;  %336 = vmatprep.mubr.msk.bf16.mxu0 %vm429_vm1, %v428_v3  ;;  %344 = vmatprep.mubr.msk.bf16.mxu1 %vm429_vm1, %v428_v3 }
   0x3   :  { %v38_v7 = vld [vmem:[%s538_s1] sm:$0xff]  ;;  %v42_v8 = vpack.c.bf16 %v41_v5, %v40_v2 }
   0x4   :  { %16 = vsyncpa [#allocation6], 0  ;;  %341 = vmatpush3.bf16.msra.mxu1 %v108_v4  ;;  %v39_v10 = vpack.c.bf16 %v38_v7, %v38_v7  ;;  %v103_v11 = vld [vmem:[%s541_s4] sm:$0xff]  ;;  %v123_v12 = vsel %vm121_vm0, %v109_v9, 0  ;;  %vm50_vm2 = vcmask 130048   ;;  %vm117_vm3 = vcmask 195584  }
   0x5   :  { %342 = vmatprep.subr.bf16.mxu1 %v428_v3  ;;  %335 = vmatpush3.bf16.msra.mxu0 %v42_v8  ;;  %v104_v13 = vpack.c.bf16 %v103_v11, %v103_v11  ;;  %s33_s18 = smul.f32 -0.5, %s537_s0  ;;  %v323_v17 = vld [vmem:[%s540_s3] ss:$0 sm:$0xff]  ;;  %vm229_vm4 = vcmask 64512   ;;  %vm272_vm5 = vcmask 57344   ;;  %vm242_vm6 = vcmask 7168  }
   0x6   :  { %348 = vmatprep.subr.bf16.mxu0 %v428_v3  ;;  %v325_v19 = vld [vmem:[%s543_s6] ss:$0 sm:$0xff]  ;;  %s430_s3 = smov [#allocation3]  }
   0x7   :  { %v34_v14 = vstv %s33_s18  ;;  %s301_s6 = sshll.u32 %s430_s3, 4  ;;  %s302_s6 = int_to_ptr.vmem [resolvable:$true] %s301_s6 }
   0x8   :  { %343 = vmatpush3.bf16.msra.mxu1 %v123_v12  ;;  %337 = vmatmul.mubr.msk.bf16.vlgmr.msra.gmra.mrb[0].mxu0 %vm50_vm2, %v39_v10  ;;  %v35_v15 = vmul.f32 1.442695, %v34_v14  ;;  %s380_s22 = scalar_lea.vmem %s302_s6, 128  ;;  %p385_p1 = scmp.lt.s32.totalorder %s302_s6, %s302_s6 }
   0x9   :  { %350 = vmatprep.mubr.msk.bf16.mxu0 %vm429_vm1, %v428_v3  ;;  %p381_p0 = scmp.ne.s32.totalorder %s302_s6, %s380_s22  ;;  %p386_p2 = scmp.lt.s32.totalorder %s380_s22, %s380_s22 }
   0xa   :  { %366 = vpow2.f32 %v35_v15 }
   0xb   :  { %345 = vmatmul.mubr.msk.bf16.vlgmr.msra.gmra.mrb[0].mxu1 %vm117_vm3, %v104_v13  ;;  %p387_p3 = por %p386_p2, %p385_p1 }
   0xd   :  { %p388_p4 = pnand %p387_p3, %p381_p0 }
  0x14   :  { %v367_v16 = vpop.eup %366 }
  0x15   :  { %354 = vpush %v367_v16 }
  0x46   :  { %s355_s0 = spop %354 }
  0x47   :  { %v99_v37 = vstv %s355_s0 }
  0xdb   :  { %v88_v18 = vpop.f32.mrb[0].mxu0 }
  0xdc   :  { %v338_v20 = vpop.f32.mrb[1].mxu0  ;;  %v89_v21 = vadd.f32 %v323_v17, %v88_v18 }
  0xdd   :  { %v91_v22 = vpop.f32.mrb[2].mxu0 }
  0xde   :  { %v159_v23 = vpop.f32.mrb[0].mxu1  ;;  %v339_v24 = vpop.f32.mrb[3].mxu0  ;;  %v94_v31 = vmul.f32 %v89_v21, %v89_v21 }
  0xdf   :  { %v160_v25 = vadd.f32 %v325_v19, %v159_v23  ;;  %v346_v26 = vpop.f32.mrb[1].mxu1 }
  0xe0   :  { %v162_v27 = vpop.f32.mrb[2].mxu1 }
  0xe1   :  { %v347_v28 = vpop.f32.mrb[3].mxu1  ;;  %v165_v29 = vmul.f32 %v160_v25, %v160_v25  ;;  %v173_v30 = vadd.f32 %v160_v25, %v89_v21 }
  0xe3   :  { %166 = vadd.xlane.f32.xlu0 %v165_v29  ;;  %v175_v32 = vmul.f32 0.5, %v173_v30 }
  0xe5   :  { %176 = vst [vmem:[#allocation3] sm:$0xff] %v175_v32 }
  0xe7   :  { %95 = vadd.xlane.f32.xlu0 %v94_v31 }
 0x170   :  { %v167_v33 = vpop.xlane.xlu0 %166 }
 0x171   :  { %v168_v34 = vmax.f32 %v167_v33, 1e-24 }
 0x173   :  { %368 = vrsqrt.f32 %v168_v34 }
 0x174   :  { %v96_v35 = vpop.xlane.xlu0 %95 }
 0x175   :  { %v97_v36 = vmax.f32 %v96_v35, 1e-24 }
 0x177   :  { %370 = vrsqrt.f32 %v97_v36 }
 0x17d   :  { %v369_v38 = vpop.eup %368 }
 0x17e   :  { %v170_v39 = vmul.f32 %v369_v38, %v99_v37 }
 0x180   :  { %v171_v40 = vmul.f32 %v170_v39, %v160_v25 }
 0x181   :  { %v371_v41 = vpop.eup %370 }
 0x182   :  { %v100_v42 = vmul.f32 %v371_v41, %v99_v37  ;;  %v172_v43 = vpack.c.bf16 %v171_v40, %v171_v40 }
 0x184   :  { %v101_v44 = vmul.f32 %v100_v42, %v89_v21  ;;  %349 = vmatpush3.bf16.xpose.msra.mxu0 %v172_v43  ;;  %v218_v47 = vunpack.c.l.bf16 %v172_v43 }
 0x186   :  { %v102_v45 = vpack.c.bf16 %v101_v44, %v101_v44 }
 0x188   :  { %v217_v46 = vunpack.c.l.bf16 %v102_v45 }
 0x18a   :  { %v219_v48 = vmul.f32 %v218_v47, %v217_v46 }
 0x18b   :  { %351 = vmatmul.mubr.bf16.vlgmr.msra.gmra.mrb[4].mxu0 %v102_v45 }
 0x18c   :  { %220 = vadd.xlane.f32.xlu0 %v219_v48 }
 0x219   :  { %v221_v49 = vpop.xlane.xlu0 %220 }
 0x21a   :  { %v222_v50 = vrot.slane %v221_v49, 4 }
 0x21c   :  { %v223_v51 = vadd.f32 %v222_v50, %v221_v49 }
 0x21e   :  { %v224_v52 = vrot.slane %v223_v51, 2 }
 0x220   :  { %v225_v53 = vadd.f32 %v224_v52, %v223_v51 }
 0x222   :  { %v226_v54 = vrot.slane %v225_v53, 1 }
 0x224   :  { %v227_v55 = vadd.f32 %v226_v54, %v225_v53 }
 0x226   :  { %356 = vpush %v227_v55 }
 0x25e   :  { %v211_v56 = vpop.f32.mrb[4].mxu0 }
 0x25f   :  { %v352_v57 = vpop.f32.mrb[5].mxu0  ;;  %v230_v58 = vsel %vm229_vm4, %v211_v56, -inf }
 0x260   :  { %231 = vmax.xlane.f32.xlu1 %v230_v58  ;;  %v253_v59 = vrot.slane %v230_v58, 4  ;;  %v214_v60 = vpop.f32.mrb[6].mxu0 }
 0x261   :  { %v353_v61 = vpop.f32.mrb[7].mxu0 }
 0x262   :  { %v254_v62 = vmax.f32 %v230_v58, %v253_v59 }
 0x264   :  { %v255_v63 = vrot.slane %v254_v62, 2 }
 0x266   :  { %v256_v0 = vmax.f32 %v254_v62, %v255_v63 }
 0x268   :  { %v257_v1 = vrot.slane %v256_v0, 1 }
 0x26a   :  { %v258_v2 = vmax.f32 %v256_v0, %v257_v1 }
 0x26c   :  { %v259_v3 = vsub.f32 %v211_v56, %v258_v2 }
 0x26e   :  { %v260_v4 = vmul.f32 1.442695, %v259_v3 }
 0x270   :  { %372 = vpow2.f32 %v260_v4 }
 0x27a   :  { %v373_v5 = vpop.eup %372 }
 0x27b   :  { %v262_v6 = vsel %vm229_vm4, %v373_v5, 0.0 }
 0x27c   :  { %v263_v7 = vrot.slane %v262_v6, 4 }
 0x27e   :  { %v264_v8 = vadd.f32 %v263_v7, %v262_v6 }
 0x280   :  { %v265_v9 = vrot.slane %v264_v8, 2 }
 0x282   :  { %v266_v10 = vadd.f32 %v265_v9, %v264_v8 }
 0x284   :  { %v267_v11 = vrot.slane %v266_v10, 1 }
 0x286   :  { %v268_v12 = vadd.f32 %v267_v11, %v266_v10 }
 0x288   :  { %374 = vlog2.f32 %v268_v12 }
 0x292   :  { %v375_v13 = vpop.eup %374 }
 0x293   :  { %v270_v14 = vmul.f32 0.6931472, %v375_v13 }
 0x295   :  { %v271_v15 = vadd.f32 %v270_v14, %v258_v2 }
 0x297   :  { %v273_v16 = vsel %vm272_vm5, %v271_v15, 0.0 }
 0x298   :  { %274 = vadd.xlane.f32.xlu0 %v273_v16 }
 0x2ed   :  { %v232_v17 = vpop.xlane.xlu1 %231 }
 0x2ee   :  { %v233_v18 = vsub.f32 %v211_v56, %v232_v17 }
 0x2f0   :  { %v234_v19 = vmul.f32 1.442695, %v233_v18 }
 0x2f2   :  { %376 = vpow2.f32 %v234_v19 }
 0x2fc   :  { %v377_v20 = vpop.eup %376 }
 0x2fd   :  { %v236_v21 = vsel %vm229_vm4, %v377_v20, 0.0 }
 0x2fe   :  { %237 = vadd.xlane.f32.xlu1 %v236_v21 }
 0x38b   :  { %v238_v22 = vpop.xlane.xlu1 %237 }
 0x38c   :  { %378 = vlog2.f32 %v238_v22 }
 0x396   :  { %v379_v23 = vpop.eup %378 }
 0x397   :  { %v240_v24 = vmul.f32 0.6931472, %v379_v23 }
 0x399   :  { %v241_v25 = vadd.f32 %v240_v24, %v232_v17 }
 0x39b   :  { %v243_v26 = vsel %vm242_vm6, %v241_v25, 0.0 }
 0x39c   :  { %244 = vadd.xlane.f32.xlu1 %v243_v26 }
 0x39d   :  { %391 = shalt.err (!%p388_p4)
}
 0x39e   :  { %s392_s25 = scalar_lea.hbm %s544_s7, 128 }
 0x39f   :  { %p393_p5 = scmp.ne.s32.totalorder %s544_s7, %s392_s25  ;;  %p396_p6 = scmp.lt.u32.totalorder %s392_s25, %s544_s7 }
 0x3a1   :  { %p398_p7 = pnand %p396_p6, %p393_p5 }
 0x3a3   :  { %401 = shalt.err (!%p398_p7)
}
 0x3a4   :  { %304 = dma.vmem_to_hbm [thread:$0]  %s302_s6, 128, %s544_s7, [#allocation4]   ;;  %v275_v27 = vpop.xlane.xlu0 %274  ;;  %vm293_vm7 = vcmask 0  }
 0x3a5   :  { %v276_v28 = vrot.slane %v275_v27, 4  ;;  %s357_s10 = spop %356  ;;  %s431_s16 = smov [#allocation5]  }
 0x3a6   :  { %s284_s7 = smul.f32 2.0, %s357_s10  ;;  %s311_s2 = sshll.u32 %s431_s16, 4  ;;  %s312_s2 = int_to_ptr.vmem [resolvable:$true] %s311_s2 }
 0x3a7   :  { %v277_v29 = vadd.f32 %v276_v28, %v275_v27  ;;  %s402_s1 = scalar_lea.vmem %s312_s2, 16  ;;  %s406_s5 = scalar_lea.vmem %s312_s2, 32 }
 0x3a8   :  { %p403_p8 = scmp.ne.s32.totalorder %s312_s2, %s402_s1  ;;  %p407_p9 = scmp.lt.s32.totalorder %s312_s2, %s312_s2 }
 0x3a9   :  { %v278_v30 = vrot.slane %v277_v29, 2  ;;  %p408_p10 = scmp.lt.s32.totalorder %s406_s5, %s402_s1 }
 0x3ab   :  { %v279_v34 = vadd.f32 %v278_v30, %v277_v29  ;;  %p409_p11 = por %p408_p10, %p407_p9 }
 0x3ad   :  { %v280_v37 = vrot.slane %v279_v34, 1  ;;  %p410_p12 = pnand %p409_p11, %p403_p8 }
 0x3af   :  { %v281_v40 = vadd.f32 %v280_v37, %v279_v34 }
 0x429   :  { %v245_v31 = vpop.xlane.xlu1 %244 }
 0x42a   :  { %v246_v32 = vrot.slane %v245_v31, 4 }
 0x42c   :  { %v247_v33 = vadd.f32 %v246_v32, %v245_v31 }
 0x42e   :  { %v248_v35 = vrot.slane %v247_v33, 2 }
 0x430   :  { %v249_v36 = vadd.f32 %v248_v35, %v247_v33 }
 0x432   :  { %v250_v38 = vrot.slane %v249_v36, 1 }
 0x434   :  { %v251_v39 = vadd.f32 %v250_v38, %v249_v36 }
 0x436   :  { %358 = vpush %v251_v39 }
 0x437   :  { %360 = vpush %v281_v40 }
 0x467   :  { %s359_s11 = spop %358 }
 0x468   :  { %s361_s12 = spop %360 }
 0x469   :  { %s283_s13 = sadd.f32 %s361_s12, %s359_s11 }
 0x46b   :  { %s285_s14 = ssub.f32 %s283_s13, %s284_s7 }
 0x46d   :  { %s288_s15 = smul.f32 0.125, %s285_s14 }
 0x46f   :  { %s291_s17 = smul.f32 0.5, %s288_s15 }
 0x471   :  { %v292_v41 = vstv %s291_s17 }
 0x472   :  { %294 = vst.msk [vmem:[#allocation5] sm:$0x1] %vm293_vm7, %v292_v41 }
 0x473   :  { %413 = shalt.err (!%p410_p12)
}
 0x474   :  { %s414_s19 = scalar_lea.hbm %s545_s8, 16 }
 0x475   :  { %p415_p13 = scmp.ne.s32.totalorder %s545_s8, %s414_s19  ;;  %p418_p0 = scmp.lt.u32.totalorder %s414_s19, %s545_s8 }
 0x477   :  { %p420_p1 = pnand %p418_p0, %p415_p13 }
 0x479   :  { %423 = shalt.err (!%p420_p1)
}
 0x47a   :  { %314 = dma.vmem_to_hbm [thread:$0]  %s312_s2, 16, %s545_s8, [#allocation6]  }
 0x47b   :  { %424 = dma.done.wait [#allocation4], 128  }
 0x47c   :  { %425 = vsyncadd [#allocation4], 4294967168 }
 0x47d   :  { %426 = dma.done.wait [#allocation6], 16  }
 0x47e   :  { %427 = vsyncadd [#allocation6], 4294967280 }
 0x47f   :  { %321 = vsyncpa [#allocation4], 1 }
 0x480   :  { %322 = vsyncpa [#allocation6], 1 }

</bundles_post_ra>
